<compile_context>
chip_gen: v5e
topology: v5e:2x2
jax: 0.10.0
libtpu: 0.0.40
codegen_flags: <defaults>
</compile_context>

<pallas_src>
import functools

import jax
import jax.numpy as jnp
from jax import lax
from jax.experimental import pallas as pl
from jax.experimental.pallas import tpu as pltpu


def _ordinal_kernel(x_ref, w_ref, b_ref, m_ref, o_ref, *, phi: str, varphi_key: str):
    # Linear layer on the MXU: [TB, D] @ [D, C] -> [TB, C], f32 accumulation.
    logits = jnp.dot(x_ref[...], w_ref[...], preferred_element_type=jnp.float32)
    logits = logits + b_ref[...]  # bias already f32, shape (1, C)

    # phi applied to every column (vectorized, no concat/slice)...
    if phi == "abs":
        z = jnp.abs(logits)
    else:  # "square"
        z = jnp.square(logits)

    # cumsum along the class axis via a precomputed upper-triangular-ones matmul:
    #   cs[i, j] = sum_{k <= j} z[i, k]   ==   z @ M, with M[k, j] = (k <= j)
    cs = jnp.dot(z, m_ref[...], preferred_element_type=jnp.float32)

    # ...then fix column 0: the reference keeps the raw logit (no phi) in column
    # 0, and column 0 contributes to every cumulative-sum entry, so add the
    # (TB, 1) correction broadcast along classes. No iota / mask needed.
    cs = cs + (logits[:, :1] - z[:, :1])

    # varphi (negated); keyed by `phi` to match varphi_options[phi] upstream.
    if varphi_key == "abs":
        out = -jnp.abs(cs)
    else:  # "square"
        out = -jnp.square(cs)

    # NOTE: for small C the store is lane-sparse (masked vst); the output stream
    # is tiny relative to the x stream, so we accept it rather than padding C.
    o_ref[...] = out.astype(o_ref.dtype)


def _vmem_capacity_bytes() -> int:
    """Physical VMEM for this generation; conservative fallback = v7x (64 MiB)."""
    try:
        return int(pltpu.get_tpu_info().vmem_capacity_bytes)
    except Exception:
        return 64 * 1024 * 1024


def _choose_tile_b(B: int, D: int, C: int, x_itemsize: int, w_itemsize: int,
                   out_itemsize: int, tile_budget: int) -> int:
    """Bytes-based batch-tile selection.

    Accounts for ALL pipeline buffers: double-buffered x/out tiles plus the
    (double-buffered, constant index_map) weight / bias / cumsum matrix.
    Also guarantees >= 2 grid steps for B >= 16 so v7x's two TensorCores both
    get work (harmless extra steps on single-TC v5e/v6e)."""
    # Residents (constant index_map blocks are still allocated double-buffered).
    resident = 2 * D * C * w_itemsize          # weight [D, C]
    resident += 2 * C * C * 4                  # cumsum matrix [C, C] f32
    resident += 2 * max(C, 128) * 4            # bias row (lane-padded) f32
    per_row = 2 * D * x_itemsize + 2 * C * out_itemsize   # double-buffered x + out

    # Sublane alignment for the batch (second-to-last) block dim.
    align = 8 if x_itemsize >= 4 else (16 if x_itemsize == 2 else 32)

    avail = tile_budget - resident
    if avail < per_row * align:
        return align  # minimal tile; vmem_limit headroom must cover residents

    tb = avail // per_row
    if B >= 16:
        min_steps = 4 if B >= 64 else 2
        tb = min(tb, pl.cdiv(B, min_steps))
    if tb >= B:
        return B  # single full-extent block (no alignment constraint)
    tb = max(align, (tb // align) * align)
    return int(min(tb, B))


def ordinal_classifier_forward(x, weight, bias, *, phi="abs", varphi="abs",
                               tile_b=None, compute_dtype=None):
    """x: [B, D]; weight: [C, D] (PyTorch Linear layout); bias: [C].

    If `compute_dtype` (e.g. jnp.bfloat16) is given, x and weight are cast once
    at the boundary to halve HBM traffic; accumulation stays f32 and the output
    keeps the original x dtype."""
    options = ("abs", "square")
    if phi not in options:
        raise NotImplementedError(f"phi function '{phi}' is not implemented.")
    if varphi not in options:
        raise NotImplementedError(f"varphi function '{varphi}' is not implemented.")
    if x.shape[1] <= 2:
        raise ValueError("The input dimension must be greater than 2.")

    B, D = x.shape
    C, D_w = weight.shape
    assert D_w == D, "weight must be [C, D]"

    out_dtype = x.dtype
    if compute_dtype is not None:
        x = x.astype(compute_dtype)
        weight = weight.astype(compute_dtype)

    # One-time XLA-side prep (outside the per-tile critical path):
    #   * weight transposed to [D, C] -> MXU RHS already in [K, N] form,
    #   * bias as an f32 row,
    #   * M[k, j] = 1.0 iff k <= j (upper-triangular ones) -> cumsum as a matmul.
    w_t = weight.T
    b2 = bias.reshape(1, C).astype(jnp.float32)
    m = jnp.triu(jnp.ones((C, C), dtype=jnp.float32))

    # Generation-aware VMEM sizing (v5e/v6e: 128 MiB physical, v7x: 64 MiB/TC).
    cap = _vmem_capacity_bytes()
    if cap >= 100 * 1024 * 1024:
        vmem_limit = 80 * 1024 * 1024
        tile_budget = 48 * 1024 * 1024
    else:
        vmem_limit = 48 * 1024 * 1024
        tile_budget = 28 * 1024 * 1024

    tb = tile_b if tile_b is not None else _choose_tile_b(
        B, D, C, x.dtype.itemsize, w_t.dtype.itemsize,
        jnp.dtype(out_dtype).itemsize, tile_budget)
    grid = (pl.cdiv(B, tb),)

    kernel = functools.partial(
        _ordinal_kernel, phi=phi, varphi_key=phi  # reproduces varphi_options[phi]
    )

    return pl.pallas_call(
        kernel,
        out_shape=jax.ShapeDtypeStruct((B, C), out_dtype),
        grid_spec=pltpu.PrefetchScalarGridSpec(
            num_scalar_prefetch=0,
            grid=grid,
            in_specs=[
                # x: batch-tiled, double-buffered by the Pallas pipeline.
                pl.BlockSpec((tb, D), lambda i: (i, 0)),
                # weight [D, C] / bias / cumsum matrix: constant index_map
                # -> DMA'd once, VMEM-resident across grid steps.
                pl.BlockSpec((D, C), lambda i: (0, 0)),
                pl.BlockSpec((1, C), lambda i: (0, 0)),
                pl.BlockSpec((C, C), lambda i: (0, 0)),
            ],
            out_specs=pl.BlockSpec((tb, C), lambda i: (i, 0)),
        ),
        compiler_params=pltpu.CompilerParams(
            # Batch tiles are independent: shard across both TCs on v7x.
            dimension_semantics=("parallel",),
            vmem_limit_bytes=vmem_limit,
        ),
    )(x, w_t, b2, m)


def _reference(x, weight, bias, *, phi="abs"):
    """Pure-JAX reference mirroring the PyTorch forward (incl. varphi-by-phi)."""
    logits = x @ weight.T + bias
    phi_fn = jnp.abs if phi == "abs" else jnp.square
    z = jnp.concatenate([logits[:, :1], phi_fn(logits[:, 1:])], axis=1)
    z = jnp.cumsum(z, axis=1)
    varphi_fn = (lambda v: -jnp.abs(v)) if phi == "abs" else (lambda v: -jnp.square(v))
    return varphi_fn(z)


if __name__ == "__main__":
    key = jax.random.PRNGKey(0)
    k_x, k_w, k_b = jax.random.split(key, 3)

    B, D, C = 24, 32, 8  # batch, in_features, num_classes
    x = jax.random.normal(k_x, (B, D), dtype=jnp.float32)
    # Deterministic "Linear(D, C)" parameters (uniform(-1/sqrt(D), 1/sqrt(D))).
    bound = 1.0 / jnp.sqrt(jnp.float32(D))
    weight = jax.random.uniform(k_w, (C, D), minval=-bound, maxval=bound,
                                dtype=jnp.float32)
    bias = jax.random.uniform(k_b, (C,), minval=-bound, maxval=bound,
                              dtype=jnp.float32)

    ref = _reference(x, weight, bias, phi="abs")

    # tile_b=8 forces a 3-step grid so the tiled/pipelined path is exercised
    # even at these small test shapes.
    out = jax.block_until_ready(
        ordinal_classifier_forward(x, weight, bias, phi="abs", varphi="abs",
                                   tile_b=8))
    assert out.shape == (B, C)
    assert jnp.allclose(out, ref, atol=1e-5, rtol=1e-5), "mismatch vs reference (abs)"

    # Auto-tiled path (bytes-based tile selection; still >=2 grid steps for B>=16).
    out2 = jax.block_until_ready(
        ordinal_classifier_forward(x, weight, bias, phi="abs", varphi="abs"))
    assert jnp.allclose(out2, ref, atol=1e-5, rtol=1e-5), "mismatch vs reference (abs, auto)"

    # Exercise the 'square' branch as well.
    out3 = jax.block_until_ready(
        ordinal_classifier_forward(x, weight, bias, phi="square", varphi="square",
                                   tile_b=8))
    ref3 = _reference(x, weight, bias, phi="square")
    assert jnp.allclose(out3, ref3, atol=1e-5, rtol=1e-5), "mismatch vs reference (square)"

    # bf16 compute path (halves x-stream HBM traffic; f32 accumulation).
    out4 = jax.block_until_ready(
        ordinal_classifier_forward(x, weight, bias, phi="abs", varphi="abs",
                                   compute_dtype=jnp.bfloat16))
    assert out4.dtype == x.dtype
    assert jnp.allclose(out4, ref, atol=2e-1, rtol=5e-2), "mismatch vs reference (abs, bf16)"

    print("KERNEL_OK")
</pallas_src>

<mosaic_0001>
module attributes {stable_mosaic.version = 11 : i64} {
  func.func @_ordinal_kernel(%arg0: i32, %arg1: memref<8x32xf32, #tpu.memory_space<vmem>>, %arg2: memref<32x8xf32, #tpu.memory_space<vmem>>, %arg3: memref<1x8xf32, #tpu.memory_space<vmem>>, %arg4: memref<8x8xf32, #tpu.memory_space<vmem>>, %arg5: memref<8x8xf32, #tpu.memory_space<vmem>>) attributes {dimension_semantics = [#tpu.dimension_semantics<parallel>], iteration_bounds = array<i64: 3>, scalar_prefetch = 0 : i64, scratch_operands = 0 : i64, tpu.core_type = #tpu.core_type<tc>, window_params = [{transform_indices = @transform_0, window_bounds = array<i64: 8, 32>}, {pipeline_mode = #tpu.pipeline_mode<synchronous>, transform_indices = @transform_1, window_bounds = array<i64: 32, 8>}, {pipeline_mode = #tpu.pipeline_mode<synchronous>, transform_indices = @transform_2, window_bounds = array<i64: 1, 8>}, {pipeline_mode = #tpu.pipeline_mode<synchronous>, transform_indices = @transform_3, window_bounds = array<i64: 8, 8>}, {transform_indices = @transform_4, window_bounds = array<i64: 8, 8>}]} {
    %c0 = arith.constant 0 : index
    %c0_0 = arith.constant 0 : index
    %0 = vector.load %arg1[%c0, %c0_0] : memref<8x32xf32, #tpu.memory_space<vmem>>, vector<8x32xf32>
    %c0_1 = arith.constant 0 : index
    %c0_2 = arith.constant 0 : index
    %1 = vector.load %arg2[%c0_1, %c0_2] : memref<32x8xf32, #tpu.memory_space<vmem>>, vector<32x8xf32>
    %cst = arith.constant dense<0.000000e+00> : vector<8x8xf32>
    %2 = tpu.matmul %0, %1, %cst {dimension_numbers = #tpu.dot_dimension_numbers<[1], [0], [0], [1], [0, 0, 1, 1], [], []>} : vector<8x32xf32>, vector<32x8xf32>, vector<8x8xf32> -> vector<8x8xf32>
    %c0_3 = arith.constant 0 : index
    %c0_4 = arith.constant 0 : index
    %3 = vector.load %arg3[%c0_3, %c0_4] : memref<1x8xf32, #tpu.memory_space<vmem>>, vector<1x8xf32>
    %4 = vector.broadcast %3 : vector<1x8xf32> to vector<8x8xf32>
    %5 = arith.addf %2, %4 : vector<8x8xf32>
    %6 = math.absf %5 : vector<8x8xf32>
    %c0_5 = arith.constant 0 : index
    %c0_6 = arith.constant 0 : index
    %7 = vector.load %arg4[%c0_5, %c0_6] : memref<8x8xf32, #tpu.memory_space<vmem>>, vector<8x8xf32>
    %cst_7 = arith.constant dense<0.000000e+00> : vector<8x8xf32>
    %8 = tpu.matmul %6, %7, %cst_7 {dimension_numbers = #tpu.dot_dimension_numbers<[1], [0], [0], [1], [0, 0, 1, 1], [], []>} : vector<8x8xf32>, vector<8x8xf32>, vector<8x8xf32> -> vector<8x8xf32>
    %9 = vector.extract_strided_slice %5 {offsets = [0, 0], sizes = [8, 1], strides = [1, 1]} : vector<8x8xf32> to vector<8x1xf32>
    %10 = vector.extract_strided_slice %6 {offsets = [0, 0], sizes = [8, 1], strides = [1, 1]} : vector<8x8xf32> to vector<8x1xf32>
    %11 = arith.subf %9, %10 : vector<8x1xf32>
    %12 = vector.broadcast %11 : vector<8x1xf32> to vector<8x8xf32>
    %13 = arith.addf %8, %12 : vector<8x8xf32>
    %14 = math.absf %13 : vector<8x8xf32>
    %cst_8 = arith.constant 0.000000e+00 : f32
    %15 = vector.broadcast %cst_8 : f32 to vector<8x8xf32>
    %16 = arith.subf %15, %14 : vector<8x8xf32>
    %c0_9 = arith.constant 0 : index
    %c0_10 = arith.constant 0 : index
    %17 = vector.load %arg5[%c0_9, %c0_10] : memref<8x8xf32, #tpu.memory_space<vmem>>, vector<8x8xf32>
    tpu.vector_store %arg5[%c0_9, %c0_10], %16 {strides = array<i32>} : memref<8x8xf32, #tpu.memory_space<vmem>>, vector<8x8xf32>,
    return
  }
  func.func @transform_0(%arg0: i32) -> (i32, i32) {
    %c0_i32 = arith.constant 0 : i32
    %c0_i32_0 = arith.constant 0 : i32
    return %arg0, %c0_i32 : i32, i32
  }
  func.func @transform_1(%arg0: i32) -> (i32, i32) {
    %c0_i32 = arith.constant 0 : i32
    %c0_i32_0 = arith.constant 0 : i32
    %c0_i32_1 = arith.constant 0 : i32
    return %c0_i32, %c0_i32_0 : i32, i32
  }
  func.func @transform_2(%arg0: i32) -> (i32, i32) {
    %c0_i32 = arith.constant 0 : i32
    %c0_i32_0 = arith.constant 0 : i32
    %c0_i32_1 = arith.constant 0 : i32
    return %c0_i32, %c0_i32_0 : i32, i32
  }
  func.func @transform_3(%arg0: i32) -> (i32, i32) {
    %c0_i32 = arith.constant 0 : i32
    %c0_i32_0 = arith.constant 0 : i32
    %c0_i32_1 = arith.constant 0 : i32
    return %c0_i32, %c0_i32_0 : i32, i32
  }
  func.func @transform_4(%arg0: i32) -> (i32, i32) {
    %c0_i32 = arith.constant 0 : i32
    %c0_i32_0 = arith.constant 0 : i32
    return %arg0, %c0_i32 : i32, i32
  }
}

</mosaic_0001>

<bundles_post_ra>
// kernel: tpu_custom_call.1
= control target key start
LH: loop header
LB: loop body
LE: loop exit
PB: predicated region body
PF: predicated region fallthrough
CT: control target
= control target key end

     0   :  { %s370_s15 = smov 0   ;;  %s405_s0 = inlined_call_operand.vmem [shape: f32[24,32], index: 0, kind: input, shape index: {}]   ;;  %s406_s1 = inlined_call_operand.vmem [shape: f32[32,8], index: 1, kind: input, shape index: {}]   ;;  %s407_s2 = inlined_call_operand.vmem [shape: f32[1,8], index: 2, kind: input, shape index: {}]   ;;  %s408_s3 = inlined_call_operand.vmem [shape: f32[8,8], index: 3, kind: input, shape index: {}]   ;;  %s409_s4 = inlined_call_operand.vmem [shape: f32[24,8], index: 4, kind: output, shape index: {}]  }
   0x1 LB: > { %s314_s16 = sadd.s32 4294967295, %s342_s15   ;;  %p318_p0 = scmp.ge.s32.totalorder %s342_s15, 1  ;;  %s342_s15 = sphi %s370_s15, %s14_s15  }
   0x2   : > { %p161_p1 = scmp.lt.s32.totalorder %s342_s15, 4 }
   0x4   : > { %p162_p2 = pnand %p318_p0, %p161_p1 }
   0x5   : > { %p185_p3 = scmp.lt.s32.totalorder (!%p162_p2), %s314_s16, 2 }
   0x6   : > { %165 = sbr.rel (%p162_p2) target bundleno = 282 (0x11a), region = 36 }
   0xb   : > { %v197_v0 = vld [vmem:[%s406_s1 + $0x18] sm:$0xff]  ;;  %v196_v1 = vld [vmem:[%s406_s1 + $0x10] sm:$0xff]  ;;  %v195_v2 = vld [vmem:[%s406_s1 + $0x8] sm:$0xff]  ;;  %s411_s16 = smov (!%p185_p3, %s314_s16), 2  ;;  %vm202_vm0 = vcmask 261120   ;;  %v344_v6 = vmov 0  }
   0xc   : > { %218 = vmatpush.msra.mxu0 %v197_v0  ;;  %v194_v3 = vld [vmem:[%s406_s1] sm:$0xff]  ;;  %s319_s25 = sshll.u32 %s411_s16, 3  ;;  %334 = vset.pattern.permute.xlu0 %v344_v6  ;;  %vm234_vm1 = vcmask 64512  }
   0xd   : > { %s188_s28 = scalar_lea.vmem %s405_s0, %s319_s25  ;;  %v227_v5 = vld [vmem:[%s408_s3] sm:$0xff]  ;;  %s192_s9 = scalar_lea.vmem %s409_s4, %s319_s25 }
   0xe   : > { %219 = vmatpush.msra.mxu0 %v196_v1  ;;  %v193_v4 = vld [vmem:[%s188_s28] sm:$0xff]  ;;  %253 = vmatpush.msra.mxu1 %v227_v5 }
   0xf   : > { %v335_v7 = vld [vmem:[%s407_s2] ss:$0 sm:$0xff] }
  0x10   : > { %220 = vmatpush.msra.mxu0 %v195_v2 }
  0x12   : > { %221 = vmatpush.msra.mxu0 %v194_v3 }
  0x13   : > { %321 = vmatmul.msk.f32.vlgmr.msra.gmra.mxu0 %vm202_vm0, %v193_v4 }
  0x90   : > { %v223_v8 = vpop.f32.mrf.mxu0 }
  0x91   : > { %v224_v9 = vadd.f32 %v335_v7, %v223_v8 }
  0x93   : > { %v226_v10 = vand.u32 2147483647, %v224_v9 }
  0x95   : > { %322 = vmatmul.msk.f32.vlgmr.msra.gmra.mxu1 %vm234_vm1, %v226_v10  ;;  %v228_v11 = vsub.f32 %v224_v9, %v226_v10 }
  0x97   : > { %231 = vperm.xlu0 %334, %v228_v11  }
 0x109   : > { %v232_v12 = vpop.permute.xlu0 %231 }
 0x112   : > { %v255_v13 = vpop.f32.mrf.mxu1 }
 0x113   : > { %v256_v14 = vadd.f32 %v255_v13, %v232_v12 }
 0x115   : > { %v258_v15 = vand.u32 2147483647, %v256_v14 }
 0x117   : > { %v259_v16 = vsub.f32 0.0, %v258_v15 }
 0x119   : > { %260 = vst.msk [vmem:[%s192_s9] sm:$0xff] %vm234_vm1, %v259_v16 }
 0x11a PF: > { %s14_s15 = sadd.s32 1, %s342_s15  }
 0x11b   : > { %p11_p4 = scmp.ge.s32.totalorder %s14_s15, 5  }
 0x11d   :  { %13 = sbr.rel (!%p11_p4) target bundleno = 1 (0x1), region = 66 }

</bundles_post_ra>
